<compile_context>
chip_gen: v5e
topology: v5e:2x2
jax: 0.10.0
libtpu: 0.0.40
codegen_flags: <defaults>
</compile_context>

<pallas_src>
import jax
import jax.numpy as jnp
from jax.experimental import pallas as pl
from jax.experimental.pallas import tpu as pltpu


# ------------------------------ Pallas kernel -------------------------------

def _add_learned_pe_kernel(x_ref, pe_ref, o_ref):
    # x_ref : (B_blk, T*D) lane-dense slab of the input
    # pe_ref: (1, T*D)    learned positional-embedding row, VMEM-resident
    # o_ref : (B_blk, T*D)
    o_ref[...] = x_ref[...] + pe_ref[...]   # broadcast over the sublane (batch) dim


# ------------------------------ block sizing --------------------------------

def _pick_batch_block(B, row_bytes, target_bytes=1 << 20):
    """Rows per grid step: aim for ~1 MiB blocks, multiple-of-8 sublanes,
    exactly dividing B, and >= 2 grid steps when B allows (v7x megacore).
    Falls back to the full batch (always a legal full-extent block)."""
    cap = max(1, target_bytes // row_bytes)
    if B >= 2:
        cap = min(cap, B // 2)          # keep at least 2 grid steps to shard
    for bb in range(8 * (cap // 8), 0, -8):   # multiples of 8, descending
        if B % bb == 0:
            return bb
    return B                             # small / awkward B: single full block


# ------------------------------ wrapper --------------------------------------

def learned_positional_encoding(x, pos_embed_table):
    """x: (B, T, D); pos_embed_table: (max_len, D) learned parameter."""
    B, T, D = x.shape
    max_len, d_model = pos_embed_table.shape
    assert d_model == D
    assert T <= max_len, "sequence length exceeds max_len of the embedding table"

    TD = T * D
    # Free minor-dim merge (row-major): no relayout copy, lane dim becomes T*D.
    x2d = x.reshape(B, TD)

    if TD % 128 == 0:
        # Window the first T*D entries of the flattened table via BlockSpec:
        # no wrapper-side slice / extra HBM copy, and constant block index
        # keeps the PE row resident in VMEM for the whole grid.
        pe_in = pos_embed_table.reshape(1, max_len * D)
    else:
        # Fallback for odd T*D: tiny wrapper-side slice, block = full extent.
        pe_in = jax.lax.slice(pos_embed_table, (0, 0), (T, D)).reshape(1, TD)
    pe_spec = pl.BlockSpec((1, TD), lambda b: (0, 0))

    B_blk = _pick_batch_block(B, TD * x.dtype.itemsize)
    grid = (B // B_blk,)

    out2d = pl.pallas_call(
        _add_learned_pe_kernel,
        grid=grid,
        out_shape=jax.ShapeDtypeStruct((B, TD), x.dtype),
        in_specs=[
            pl.BlockSpec((B_blk, TD), lambda b: (b, 0)),
            pe_spec,
        ],
        out_specs=pl.BlockSpec((B_blk, TD), lambda b: (b, 0)),
        compiler_params=pltpu.CompilerParams(
            dimension_semantics=("parallel",),  # batch blocks shard across TCs (v7x)
        ),
    )(x2d, pe_in)

    return out2d.reshape(B, T, D)


# ------------------------------------ main -----------------------------------

if __name__ == "__main__":
    # Shapes consistent with the module: 5-min data, d_model=32, max_len=72.
    B, T, D, MAX_LEN = 2, 8, 32, 72

    key = jax.random.PRNGKey(0)
    kx, kp = jax.random.split(key)
    x = jax.random.normal(kx, (B, T, D), jnp.float32)
    # nn.Embedding default init: N(0, 1) -- this is the *learned* parameter.
    pos_embed = jax.random.normal(kp, (MAX_LEN, D), jnp.float32)

    out = jax.block_until_ready(learned_positional_encoding(x, pos_embed))

    # pure-JAX reference: x + pos_embed(arange(T))
    ref = x + pos_embed[None, :T, :]
    assert out.shape == (B, T, D), out.shape
    assert jnp.allclose(out, ref, atol=1e-6, rtol=1e-6), float(
        jnp.max(jnp.abs(out - ref)))

    print("KERNEL_OK")
</pallas_src>

<mosaic_0001>
module attributes {stable_mosaic.version = 11 : i64} {
  func.func @_add_learned_pe_kernel(%arg0: i32, %arg1: memref<2x256xf32, #tpu.memory_space<vmem>>, %arg2: memref<1x256xf32, #tpu.memory_space<vmem>>, %arg3: memref<2x256xf32, #tpu.memory_space<vmem>>) attributes {dimension_semantics = [#tpu.dimension_semantics<parallel>], iteration_bounds = array<i64: 1>, scalar_prefetch = 0 : i64, scratch_operands = 0 : i64, tpu.core_type = #tpu.core_type<tc>, window_params = [{transform_indices = @transform_0, window_bounds = array<i64: 2, 256>}, {transform_indices = @transform_1, window_bounds = array<i64: 1, 256>}, {transform_indices = @transform_2, window_bounds = array<i64: 2, 256>}]} {
    %c0 = arith.constant 0 : index
    %c0_0 = arith.constant 0 : index
    %0 = vector.load %arg1[%c0, %c0_0] : memref<2x256xf32, #tpu.memory_space<vmem>>, vector<2x256xf32>
    %c0_1 = arith.constant 0 : index
    %c0_2 = arith.constant 0 : index
    %1 = vector.load %arg2[%c0_1, %c0_2] : memref<1x256xf32, #tpu.memory_space<vmem>>, vector<1x256xf32>
    %2 = vector.broadcast %1 : vector<1x256xf32> to vector<2x256xf32>
    %3 = arith.addf %0, %2 : vector<2x256xf32>
    %c0_3 = arith.constant 0 : index
    %c0_4 = arith.constant 0 : index
    %4 = vector.load %arg3[%c0_3, %c0_4] : memref<2x256xf32, #tpu.memory_space<vmem>>, vector<2x256xf32>
    tpu.vector_store %arg3[%c0_3, %c0_4], %3 {strides = array<i32>} : memref<2x256xf32, #tpu.memory_space<vmem>>, vector<2x256xf32>,
    return
  }
  func.func @transform_0(%arg0: i32) -> (i32, i32) {
    %c0_i32 = arith.constant 0 : i32
    %c0_i32_0 = arith.constant 0 : i32
    return %arg0, %c0_i32 : i32, i32
  }
  func.func @transform_1(%arg0: i32) -> (i32, i32) {
    %c0_i32 = arith.constant 0 : i32
    %c0_i32_0 = arith.constant 0 : i32
    %c0_i32_1 = arith.constant 0 : i32
    return %c0_i32, %c0_i32_0 : i32, i32
  }
  func.func @transform_2(%arg0: i32) -> (i32, i32) {
    %c0_i32 = arith.constant 0 : i32
    %c0_i32_0 = arith.constant 0 : i32
    return %arg0, %c0_i32 : i32, i32
  }
}

</mosaic_0001>

<bundles_post_ra>
// kernel: tpu_custom_call.1
= control target key start
LH: loop header
LB: loop body
LE: loop exit
PB: predicated region body
PF: predicated region fallthrough
CT: control target
= control target key end

     0   :  { %7 = vsyncpa [#allocation3], 0  ;;  %s177_s0 = inlined_call_operand.hbm [shape: f32[2,256], index: 0, kind: input, shape index: {}]   ;;  %s178_s1 = inlined_call_operand.hbm [shape: f32[1,2304], index: 1, kind: input, shape index: {}]   ;;  %s179_s2 = inlined_call_operand.hbm [shape: f32[2,256], index: 2, kind: output, shape index: {}]  }
   0x1   :  { %8 = vsyncpa [#allocation6], 0 }
   0x2   :  { %9 = vsyncpa [#allocation4], 0  ;;  %s15_s11 = sshll.u32 %s177_s0, 4  ;;  %s150_s12 = smov [#allocation2]   ;;  %s16_s11 = int_to_ptr.hbm [resolvable:$true] %s15_s11 }
   0x3   :  { %s17_s13 = sshll.u32 %s150_s12, 4  ;;  %s26_s16 = sshll.u32 %s178_s1, 4  ;;  %s18_s13 = int_to_ptr.vmem [resolvable:$true] %s17_s13  ;;  %s27_s16 = int_to_ptr.hbm [resolvable:$true] %s26_s16 }
   0x4   :  { %20 = dma.hbm_to_vmem [thread:$0]  %s16_s11, 64, %s18_s13, [#allocation3]  }
   0x5   :  { %s151_s17 = smov [#allocation5]  }
   0x6   :  { %s28_s18 = sshll.u32 %s151_s17, 4  ;;  %s29_s18 = int_to_ptr.vmem [resolvable:$true] %s28_s18 }
   0x7   :  { %31 = dma.hbm_to_vmem [thread:$0]  %s27_s16, 32, %s29_s18, [#allocation6]  }
   0x8   :  { %144 = dma.done.wait [#allocation3], 64  }
   0x9   :  { %145 = vsyncadd [#allocation3], 4294967232 }
   0xa   :  { %146 = dma.done.wait [#allocation6], 32  }
   0xb   :  { %147 = vsyncadd [#allocation6], 4294967264  ;;  %v41_v0 = vld [vmem:[#allocation5] sm:$0x3]  ;;  %vm46_vm0 = vcmask 1041408   ;;  %s152_s0 = smov [#allocation7]  }
   0xc   :  { %v43_v1 = vperm.slane %v41_v0, 0  ;;  %v44_v2 = vperm.slane %v41_v0, 1  ;;  %v40_v3 = vld [vmem:[#allocation2] sm:$0xf]  ;;  %s56_s19 = sshll.u32 %s152_s0, 4  ;;  %s58_s21 = sshll.u32 %s179_s2, 4  ;;  %s57_s19 = int_to_ptr.vmem [resolvable:$true] %s56_s19  ;;  %s59_s21 = int_to_ptr.hbm [resolvable:$true] %s58_s21 }
   0xe   :  { %v45_v4 = vrot.slane %v44_v2, 6 }
  0x10   :  { %v47_v5 = vsel %vm46_vm0, %v43_v1, %v45_v4 }
  0x11   :  { %v49_v6 = vadd.f32 %v47_v5, %v40_v3 }
  0x13   :  { %50 = vst [vmem:[#allocation7] sm:$0xf] %v49_v6 }
  0x14   :  { %61 = dma.vmem_to_hbm [thread:$0]  %s57_s19, 64, %s59_s21, [#allocation4]  }
  0x15   :  { %148 = dma.done.wait [#allocation4], 64  }
  0x16   :  { %149 = vsyncadd [#allocation4], 4294967232 }
  0x17   :  { %66 = vsyncpa [#allocation3], 1 }
  0x18   :  { %67 = vsyncpa [#allocation6], 1 }
  0x19   :  { %68 = vsyncpa [#allocation4], 1 }

</bundles_post_ra>
